<compile_context>
chip_gen: v6e
topology: v6e:2x2x1
jax: 0.10.0
libtpu: 0.0.40
codegen_flags: <defaults>
</compile_context>

<pallas_src>
import jax
import jax.numpy as jnp
import numpy as np
from jax import lax
from jax.experimental import pallas as pl
from jax.experimental.pallas import tpu as pltpu


def cnn_kernel(xt_ref, w1_ref, b1_ref, w2_ref, b2_ref,
               fw1_ref, fb1_ref, fw2_ref, fb2_ref, out_ref, ms_ref):
    """One batch-block of the forward pass; batch folded into matmul rows.

    xt_ref : (4, BB*L2, 1)  conv1 taps: xt[j, b*L2+t, 0] = x_pad[b, 2t + j]
    w1_ref : (3, 1, C1)     conv1 weights per tap
    b1_ref : (1, C1)
    w2_ref : (3, C1, C2)    conv2 weights per tap
    b2_ref : (1, C2)
    fw1_ref: (L4*C2, H)     fc1 weights, rows (t*C2 + c)   (pre-permuted)
    fb1_ref: (1, H)
    fw2_ref: (H, NCP)       fc2 weights, lane-padded to NCP
    fb2_ref: (1, NCP)
    out_ref: (BB, NCP)
    ms_ref : (BB*L2, C2)    scratch holding max(h2[r], h2[r+1])
    """
    M = xt_ref.shape[1]              # BB * L2  (rows: batch-major, time-minor)
    C1 = w1_ref.shape[2]
    C2 = w2_ref.shape[2]
    L4 = fw1_ref.shape[0] // C2
    L2 = 2 * L4
    BB = M // L2

    # ---- conv1 (k=3, pad=1) + ReLU + MaxPool1d(2), entirely on the VPU ----
    w1_0 = w1_ref[0]
    w1_1 = w1_ref[1]
    w1_2 = w1_ref[2]                 # (1, C1)
    b1 = b1_ref[...]                 # (1, C1)
    x0 = xt_ref[0]
    x1 = xt_ref[1]
    x2 = xt_ref[2]
    x3 = xt_ref[3]                   # (M, 1)
    acc_e = x0 * w1_0 + x1 * w1_1 + x2 * w1_2 + b1       # conv1 at time 2t
    acc_o = x1 * w1_0 + x2 * w1_1 + x3 * w1_2 + b1       # conv1 at time 2t+1
    p1 = jnp.maximum(jnp.maximum(acc_e, acc_o), 0.0)     # pool(relu(.)) -> (M, C1)

    # ---- conv2 (k=3, pad=1): 3 shifted-tap matmuls, batch folded into M ----
    t_in = lax.broadcasted_iota(jnp.int32, (M, C1), 0) % L2
    zero = jnp.zeros_like(p1)
    tap_prev = jnp.where(t_in == 0, zero, pltpu.roll(p1, shift=1, axis=0))
    tap_next = jnp.where(t_in == L2 - 1, zero, pltpu.roll(p1, shift=M - 1, axis=0))
    h2 = (jnp.dot(tap_prev, w2_ref[0], preferred_element_type=jnp.float32)
          + jnp.dot(p1, w2_ref[1], preferred_element_type=jnp.float32)
          + jnp.dot(tap_next, w2_ref[2], preferred_element_type=jnp.float32)
          + b2_ref[...])
    h2 = jnp.maximum(h2, 0.0)                            # (M, C2)

    # ---- MaxPool1d(2) + flatten: pairwise max, then strided scratch reads ----
    # ms[r] = max(h2[r], h2[r+1]); pooled (b, t) value lives at row b*L2 + 2t.
    ms_ref[...] = jnp.maximum(h2, pltpu.roll(h2, shift=M - 1, axis=0))
    flat = jnp.concatenate(
        [ms_ref[pl.ds(2 * t, BB, stride=L2), :] for t in range(L4)],
        axis=1)                                          # (BB, L4*C2), t-major c-minor

    # ---- fc1 + ReLU, fc2 (lane-padded output) ----
    f1 = jnp.dot(flat, fw1_ref[...], preferred_element_type=jnp.float32) + fb1_ref[...]
    f1 = jnp.maximum(f1, 0.0)                            # (BB, H)
    out_ref[...] = (jnp.dot(f1, fw2_ref[...], preferred_element_type=jnp.float32)
                    + fb2_ref[...])                      # (BB, NCP)


def cnn_classify_forward(x, w1, b1, w2, b2, fw1, fb1, fw2, fb2):
    """x: (B, 1, L) float32 — same convention as the PyTorch module."""
    B, cin, L = x.shape
    assert cin == 1 and L % 4 == 0
    L2, L4 = L // 2, L // 4
    C1 = w1.shape[0]                  # 16
    C2 = w2.shape[0]                  # 32
    H = fw1.shape[0]                  # 128
    NC = fw2.shape[0]                 # num_classes
    NCP = ((NC + 127) // 128) * 128   # lane-dense output width
    BB = B if B <= 8 else 8           # batch block (grid axis -> v7x megacore)
    assert B % BB == 0
    nb = B // BB

    # --- wrapper-side layout prep (plain JAX): padding + tap extraction ride the DMA ---
    xp = jnp.pad(x[:, 0, :], ((0, 0), (1, 1)))                           # (B, L+2)
    # taps j=0..3: xt[j, b*L2 + t, 0] = x_pad[b, 2t + j]  (even/odd pool phases)
    xt = jnp.stack([xp[:, j:j + L - 1:2] for j in range(4)], axis=0)     # (4, B, L2)
    xt = xt.reshape(4, B * L2, 1)

    w1m = jnp.transpose(w1, (2, 1, 0))                                   # (3, 1, C1)
    w2m = jnp.transpose(w2, (2, 1, 0))                                   # (3, C1, C2)
    # torch flattens channel-major (c*L4 + t); kernel flattens t-major -> permute fc1 rows
    fw1p = jnp.transpose(fw1.reshape(H, C2, L4), (2, 1, 0)).reshape(L4 * C2, H)
    fw2p = jnp.zeros((H, NCP), fw2.dtype).at[:, :NC].set(jnp.transpose(fw2))
    fb2p = jnp.zeros((1, NCP), fb2.dtype).at[:, :NC].set(fb2.reshape(1, NC))

    grid_spec = pltpu.PrefetchScalarGridSpec(
        num_scalar_prefetch=0,
        grid=(nb,),
        in_specs=[
            pl.BlockSpec((4, BB * L2, 1), lambda i: (0, i, 0)),
            pl.BlockSpec((3, 1, C1), lambda i: (0, 0, 0)),
            pl.BlockSpec((1, C1), lambda i: (0, 0)),
            pl.BlockSpec((3, C1, C2), lambda i: (0, 0, 0)),
            pl.BlockSpec((1, C2), lambda i: (0, 0)),
            pl.BlockSpec((L4 * C2, H), lambda i: (0, 0)),
            pl.BlockSpec((1, H), lambda i: (0, 0)),
            pl.BlockSpec((H, NCP), lambda i: (0, 0)),
            pl.BlockSpec((1, NCP), lambda i: (0, 0)),
        ],
        out_specs=pl.BlockSpec((BB, NCP), lambda i: (i, 0)),
        scratch_shapes=[pltpu.VMEM((BB * L2, C2), jnp.float32)],
    )

    out = pl.pallas_call(
        cnn_kernel,
        out_shape=jax.ShapeDtypeStruct((B, NCP), jnp.float32),
        grid_spec=grid_spec,
        compiler_params=pltpu.CompilerParams(dimension_semantics=("parallel",)),
    )(xt, w1m, b1.reshape(1, C1), w2m, b2.reshape(1, C2),
      fw1p, fb1.reshape(1, H), fw2p, fb2p)
    return out[:, :NC]


def ref_forward(x, w1, b1, w2, b2, fw1, fb1, fw2, fb2):
    """Pure-JAX reference mirroring the PyTorch forward (NCL layout)."""
    def conv1d(x, w, b):                                   # x (B,Cin,L), w (Cout,Cin,3), pad 1
        L = x.shape[2]
        xp = jnp.pad(x, ((0, 0), (0, 0), (1, 1)))
        taps = jnp.stack([xp[:, :, k:k + L] for k in range(3)], axis=-1)  # (B,Cin,L,3)
        return jnp.einsum('bilk,oik->bol', taps, w) + b[None, :, None]

    def pool(x):                                           # MaxPool1d(2)
        B, C, L = x.shape
        return jnp.max(x.reshape(B, C, L // 2, 2), axis=-1)

    h = pool(jax.nn.relu(conv1d(x, w1, b1)))
    h = pool(jax.nn.relu(conv1d(h, w2, b2)))
    h = h.reshape(h.shape[0], -1)
    h = jax.nn.relu(h @ fw1.T + fb1)
    return h @ fw2.T + fb2


if __name__ == "__main__":
    B, L, NC = 2, 16, 4                     # batch, input_length, num_classes
    C1, C2, H = 16, 32, 128
    F = C2 * (L // 4)                       # flat dim actually produced by the forward

    key = jax.random.PRNGKey(0)
    ks = jax.random.split(key, 9)
    x = jax.random.normal(ks[0], (B, 1, L), jnp.float32)
    w1 = 0.1 * jax.random.normal(ks[1], (C1, 1, 3), jnp.float32)
    b1 = 0.1 * jax.random.normal(ks[2], (C1,), jnp.float32)
    w2 = 0.1 * jax.random.normal(ks[3], (C2, C1, 3), jnp.float32)
    b2 = 0.1 * jax.random.normal(ks[4], (C2,), jnp.float32)
    fw1 = 0.1 * jax.random.normal(ks[5], (H, F), jnp.float32)
    fb1 = 0.1 * jax.random.normal(ks[6], (H,), jnp.float32)
    fw2 = 0.1 * jax.random.normal(ks[7], (NC, H), jnp.float32)
    fb2 = 0.1 * jax.random.normal(ks[8], (NC,), jnp.float32)

    out = cnn_classify_forward(x, w1, b1, w2, b2, fw1, fb1, fw2, fb2)
    out = jax.block_until_ready(out)

    ref = ref_forward(x, w1, b1, w2, b2, fw1, fb1, fw2, fb2)
    np.testing.assert_allclose(np.asarray(out), np.asarray(ref), rtol=1e-4, atol=1e-4)

    print("KERNEL_OK")
</pallas_src>

<mosaic_0001>
module attributes {stable_mosaic.version = 11 : i64} {
  func.func @cnn_kernel(%arg0: i32, %arg1: memref<4x16x1xf32, #tpu.memory_space<vmem>>, %arg2: memref<3x1x16xf32, #tpu.memory_space<vmem>>, %arg3: memref<1x16xf32, #tpu.memory_space<vmem>>, %arg4: memref<3x16x32xf32, #tpu.memory_space<vmem>>, %arg5: memref<1x32xf32, #tpu.memory_space<vmem>>, %arg6: memref<128x128xf32, #tpu.memory_space<vmem>>, %arg7: memref<1x128xf32, #tpu.memory_space<vmem>>, %arg8: memref<128x128xf32, #tpu.memory_space<vmem>>, %arg9: memref<1x128xf32, #tpu.memory_space<vmem>>, %arg10: memref<2x128xf32, #tpu.memory_space<vmem>>, %arg11: memref<16x32xf32, #tpu.memory_space<vmem>>) attributes {dimension_semantics = [#tpu.dimension_semantics<parallel>], iteration_bounds = array<i64: 1>, scalar_prefetch = 0 : i64, scratch_operands = 1 : i64, tpu.core_type = #tpu.core_type<tc>, window_params = [{transform_indices = @transform_0, window_bounds = array<i64: 4, 16, 1>}, {pipeline_mode = #tpu.pipeline_mode<synchronous>, transform_indices = @transform_1, window_bounds = array<i64: 3, 1, 16>}, {pipeline_mode = #tpu.pipeline_mode<synchronous>, transform_indices = @transform_2, window_bounds = array<i64: 1, 16>}, {pipeline_mode = #tpu.pipeline_mode<synchronous>, transform_indices = @transform_3, window_bounds = array<i64: 3, 16, 32>}, {pipeline_mode = #tpu.pipeline_mode<synchronous>, transform_indices = @transform_4, window_bounds = array<i64: 1, 32>}, {pipeline_mode = #tpu.pipeline_mode<synchronous>, transform_indices = @transform_5, window_bounds = array<i64: 128, 128>}, {pipeline_mode = #tpu.pipeline_mode<synchronous>, transform_indices = @transform_6, window_bounds = array<i64: 1, 128>}, {pipeline_mode = #tpu.pipeline_mode<synchronous>, transform_indices = @transform_7, window_bounds = array<i64: 128, 128>}, {pipeline_mode = #tpu.pipeline_mode<synchronous>, transform_indices = @transform_8, window_bounds = array<i64: 1, 128>}, {transform_indices = @transform_9, window_bounds = array<i64: 2, 128>}]} {
    %c0 = arith.constant 0 : index
    %c0_0 = arith.constant 0 : index
    %c0_1 = arith.constant 0 : index
    %0 = vector.load %arg2[%c0, %c0_0, %c0_1] : memref<3x1x16xf32, #tpu.memory_space<vmem>>, vector<1x1x16xf32>
    %1 = vector.shape_cast %0 : vector<1x1x16xf32> to vector<1x16xf32>
    %c1 = arith.constant 1 : index
    %c0_2 = arith.constant 0 : index
    %c0_3 = arith.constant 0 : index
    %2 = vector.load %arg2[%c1, %c0_2, %c0_3] : memref<3x1x16xf32, #tpu.memory_space<vmem>>, vector<1x1x16xf32>
    %3 = vector.shape_cast %2 : vector<1x1x16xf32> to vector<1x16xf32>
    %c2 = arith.constant 2 : index
    %c0_4 = arith.constant 0 : index
    %c0_5 = arith.constant 0 : index
    %4 = vector.load %arg2[%c2, %c0_4, %c0_5] : memref<3x1x16xf32, #tpu.memory_space<vmem>>, vector<1x1x16xf32>
    %5 = vector.shape_cast %4 : vector<1x1x16xf32> to vector<1x16xf32>
    %c0_6 = arith.constant 0 : index
    %c0_7 = arith.constant 0 : index
    %6 = vector.load %arg3[%c0_6, %c0_7] : memref<1x16xf32, #tpu.memory_space<vmem>>, vector<1x16xf32>
    %c0_8 = arith.constant 0 : index
    %c0_9 = arith.constant 0 : index
    %c0_10 = arith.constant 0 : index
    %7 = vector.load %arg1[%c0_8, %c0_9, %c0_10] : memref<4x16x1xf32, #tpu.memory_space<vmem>>, vector<1x16x1xf32>
    %8 = vector.shape_cast %7 : vector<1x16x1xf32> to vector<16x1xf32>
    %c1_11 = arith.constant 1 : index
    %c0_12 = arith.constant 0 : index
    %c0_13 = arith.constant 0 : index
    %9 = vector.load %arg1[%c1_11, %c0_12, %c0_13] : memref<4x16x1xf32, #tpu.memory_space<vmem>>, vector<1x16x1xf32>
    %10 = vector.shape_cast %9 : vector<1x16x1xf32> to vector<16x1xf32>
    %c2_14 = arith.constant 2 : index
    %c0_15 = arith.constant 0 : index
    %c0_16 = arith.constant 0 : index
    %11 = vector.load %arg1[%c2_14, %c0_15, %c0_16] : memref<4x16x1xf32, #tpu.memory_space<vmem>>, vector<1x16x1xf32>
    %12 = vector.shape_cast %11 : vector<1x16x1xf32> to vector<16x1xf32>
    %c3 = arith.constant 3 : index
    %c0_17 = arith.constant 0 : index
    %c0_18 = arith.constant 0 : index
    %13 = vector.load %arg1[%c3, %c0_17, %c0_18] : memref<4x16x1xf32, #tpu.memory_space<vmem>>, vector<1x16x1xf32>
    %14 = vector.shape_cast %13 : vector<1x16x1xf32> to vector<16x1xf32>
    %15 = vector.broadcast %8 : vector<16x1xf32> to vector<16x16xf32>
    %16 = vector.broadcast %1 : vector<1x16xf32> to vector<16x16xf32>
    %17 = arith.mulf %15, %16 : vector<16x16xf32>
    %18 = vector.broadcast %10 : vector<16x1xf32> to vector<16x16xf32>
    %19 = vector.broadcast %3 : vector<1x16xf32> to vector<16x16xf32>
    %20 = arith.mulf %18, %19 : vector<16x16xf32>
    %21 = arith.addf %17, %20 : vector<16x16xf32>
    %22 = vector.broadcast %12 : vector<16x1xf32> to vector<16x16xf32>
    %23 = vector.broadcast %5 : vector<1x16xf32> to vector<16x16xf32>
    %24 = arith.mulf %22, %23 : vector<16x16xf32>
    %25 = arith.addf %21, %24 : vector<16x16xf32>
    %26 = vector.broadcast %6 : vector<1x16xf32> to vector<16x16xf32>
    %27 = arith.addf %25, %26 : vector<16x16xf32>
    %28 = vector.broadcast %10 : vector<16x1xf32> to vector<16x16xf32>
    %29 = vector.broadcast %1 : vector<1x16xf32> to vector<16x16xf32>
    %30 = arith.mulf %28, %29 : vector<16x16xf32>
    %31 = vector.broadcast %12 : vector<16x1xf32> to vector<16x16xf32>
    %32 = vector.broadcast %3 : vector<1x16xf32> to vector<16x16xf32>
    %33 = arith.mulf %31, %32 : vector<16x16xf32>
    %34 = arith.addf %30, %33 : vector<16x16xf32>
    %35 = vector.broadcast %14 : vector<16x1xf32> to vector<16x16xf32>
    %36 = vector.broadcast %5 : vector<1x16xf32> to vector<16x16xf32>
    %37 = arith.mulf %35, %36 : vector<16x16xf32>
    %38 = arith.addf %34, %37 : vector<16x16xf32>
    %39 = vector.broadcast %6 : vector<1x16xf32> to vector<16x16xf32>
    %40 = arith.addf %38, %39 : vector<16x16xf32>
    %41 = arith.maximumf %27, %40 : vector<16x16xf32>
    %cst = arith.constant 0.000000e+00 : f32
    %42 = vector.broadcast %cst : f32 to vector<16x16xf32>
    %43 = arith.maximumf %41, %42 : vector<16x16xf32>
    %44 = tpu.iota {dimensions = array<i32: 0>} : vector<16x16xi32>
    %c8_i32 = arith.constant 8 : i32
    %c0_i32 = arith.constant 0 : i32
    %45 = arith.cmpi eq, %c8_i32, %c0_i32 : i32
    %c1_i32 = arith.constant 1 : i32
    %46 = arith.select %45, %c1_i32, %c8_i32 : i32
    %47 = vector.broadcast %46 : i32 to vector<16x16xi32>
    %48 = arith.remsi %44, %47 : vector<16x16xi32>
    %c0_i32_19 = arith.constant 0 : i32
    %49 = vector.broadcast %c0_i32_19 : i32 to vector<16x16xi32>
    %50 = arith.cmpi ne, %48, %49 : vector<16x16xi32>
    %c0_i32_20 = arith.constant 0 : i32
    %51 = vector.broadcast %c0_i32_20 : i32 to vector<16x16xi32>
    %52 = arith.cmpi slt, %48, %51 : vector<16x16xi32>
    %c0_i32_21 = arith.constant 0 : i32
    %53 = arith.cmpi slt, %46, %c0_i32_21 : i32
    %54 = vector.broadcast %53 : i1 to vector<16x16xi1>
    %55 = vector.broadcast %54 : vector<16x16xi1> to vector<16x16xi1>
    %56 = arith.xori %52, %55 : vector<16x16xi1>
    %57 = arith.andi %56, %50 : vector<16x16xi1>
    %58 = vector.broadcast %46 : i32 to vector<16x16xi32>
    %59 = arith.addi %48, %58 : vector<16x16xi32>
    %60 = arith.select %57, %59, %48 : vector<16x16xi1>, vector<16x16xi32>
    %cst_22 = arith.constant 0.000000e+00 : f32
    %61 = vector.broadcast %cst_22 : f32 to vector<16x16xf32>
    %c0_i32_23 = arith.constant 0 : i32
    %62 = vector.broadcast %c0_i32_23 : i32 to vector<16x16xi32>
    %63 = arith.cmpi eq, %60, %62 : vector<16x16xi32>
    %c1_i32_24 = arith.constant 1 : i32
    %64 = tpu.dynamic_rotate %43 by %c1_i32_24 dim 0 : vector<16x16xf32>, i32 -> vector<16x16xf32>
    %65 = arith.select %63, %61, %64 : vector<16x16xi1>, vector<16x16xf32>
    %c7_i32 = arith.constant 7 : i32
    %66 = vector.broadcast %c7_i32 : i32 to vector<16x16xi32>
    %67 = arith.cmpi eq, %60, %66 : vector<16x16xi32>
    %c15_i32 = arith.constant 15 : i32
    %68 = tpu.dynamic_rotate %43 by %c15_i32 dim 0 : vector<16x16xf32>, i32 -> vector<16x16xf32>
    %69 = arith.select %67, %61, %68 : vector<16x16xi1>, vector<16x16xf32>
    %c0_25 = arith.constant 0 : index
    %c0_26 = arith.constant 0 : index
    %c0_27 = arith.constant 0 : index
    %70 = vector.load %arg4[%c0_25, %c0_26, %c0_27] : memref<3x16x32xf32, #tpu.memory_space<vmem>>, vector<1x16x32xf32>
    %71 = vector.shape_cast %70 : vector<1x16x32xf32> to vector<16x32xf32>
    %cst_28 = arith.constant dense<0.000000e+00> : vector<16x32xf32>
    %72 = tpu.matmul %65, %71, %cst_28 {dimension_numbers = #tpu.dot_dimension_numbers<[1], [0], [0], [1], [0, 0, 1, 1], [], []>} : vector<16x16xf32>, vector<16x32xf32>, vector<16x32xf32> -> vector<16x32xf32>
    %c1_29 = arith.constant 1 : index
    %c0_30 = arith.constant 0 : index
    %c0_31 = arith.constant 0 : index
    %73 = vector.load %arg4[%c1_29, %c0_30, %c0_31] : memref<3x16x32xf32, #tpu.memory_space<vmem>>, vector<1x16x32xf32>
    %74 = vector.shape_cast %73 : vector<1x16x32xf32> to vector<16x32xf32>
    %cst_32 = arith.constant dense<0.000000e+00> : vector<16x32xf32>
    %75 = tpu.matmul %43, %74, %cst_32 {dimension_numbers = #tpu.dot_dimension_numbers<[1], [0], [0], [1], [0, 0, 1, 1], [], []>} : vector<16x16xf32>, vector<16x32xf32>, vector<16x32xf32> -> vector<16x32xf32>
    %76 = arith.addf %72, %75 : vector<16x32xf32>
    %c2_33 = arith.constant 2 : index
    %c0_34 = arith.constant 0 : index
    %c0_35 = arith.constant 0 : index
    %77 = vector.load %arg4[%c2_33, %c0_34, %c0_35] : memref<3x16x32xf32, #tpu.memory_space<vmem>>, vector<1x16x32xf32>
    %78 = vector.shape_cast %77 : vector<1x16x32xf32> to vector<16x32xf32>
    %cst_36 = arith.constant dense<0.000000e+00> : vector<16x32xf32>
    %79 = tpu.matmul %69, %78, %cst_36 {dimension_numbers = #tpu.dot_dimension_numbers<[1], [0], [0], [1], [0, 0, 1, 1], [], []>} : vector<16x16xf32>, vector<16x32xf32>, vector<16x32xf32> -> vector<16x32xf32>
    %80 = arith.addf %76, %79 : vector<16x32xf32>
    %c0_37 = arith.constant 0 : index
    %c0_38 = arith.constant 0 : index
    %81 = vector.load %arg5[%c0_37, %c0_38] : memref<1x32xf32, #tpu.memory_space<vmem>>, vector<1x32xf32>
    %82 = vector.broadcast %81 : vector<1x32xf32> to vector<16x32xf32>
    %83 = arith.addf %80, %82 : vector<16x32xf32>
    %cst_39 = arith.constant 0.000000e+00 : f32
    %84 = vector.broadcast %cst_39 : f32 to vector<16x32xf32>
    %85 = arith.maximumf %83, %84 : vector<16x32xf32>
    %c15_i32_40 = arith.constant 15 : i32
    %86 = tpu.dynamic_rotate %85 by %c15_i32_40 dim 0 : vector<16x32xf32>, i32 -> vector<16x32xf32>
    %87 = arith.maximumf %85, %86 : vector<16x32xf32>
    %c0_41 = arith.constant 0 : index
    %c0_42 = arith.constant 0 : index
    %88 = vector.load %arg11[%c0_41, %c0_42] : memref<16x32xf32, #tpu.memory_space<vmem>>, vector<16x32xf32>
    tpu.vector_store %arg11[%c0_41, %c0_42], %87 {strides = array<i32>} : memref<16x32xf32, #tpu.memory_space<vmem>>, vector<16x32xf32>,
    %c0_43 = arith.constant 0 : index
    %c0_44 = arith.constant 0 : index
    %89 = tpu.strided_load %arg11[%c0_43, %c0_44] {strides = array<i32: 8, 1>} : memref<16x32xf32, #tpu.memory_space<vmem>>, vector<2x32xf32>
    %c2_45 = arith.constant 2 : index
    %c0_46 = arith.constant 0 : index
    %90 = tpu.strided_load %arg11[%c2_45, %c0_46] {strides = array<i32: 8, 1>} : memref<16x32xf32, #tpu.memory_space<vmem>>, vector<2x32xf32>
    %c4 = arith.constant 4 : index
    %c0_47 = arith.constant 0 : index
    %91 = tpu.strided_load %arg11[%c4, %c0_47] {strides = array<i32: 8, 1>} : memref<16x32xf32, #tpu.memory_space<vmem>>, vector<2x32xf32>
    %c6 = arith.constant 6 : index
    %c0_48 = arith.constant 0 : index
    %92 = tpu.strided_load %arg11[%c6, %c0_48] {strides = array<i32: 8, 1>} : memref<16x32xf32, #tpu.memory_space<vmem>>, vector<2x32xf32>
    %93 = tpu.concatenate %89, %90, %91, %92 in 1 : vector<2x32xf32>, vector<2x32xf32>, vector<2x32xf32>, vector<2x32xf32> -> vector<2x128xf32>
    %c0_49 = arith.constant 0 : index
    %c0_50 = arith.constant 0 : index
    %94 = vector.load %arg6[%c0_49, %c0_50] : memref<128x128xf32, #tpu.memory_space<vmem>>, vector<128x128xf32>
    %cst_51 = arith.constant dense<0.000000e+00> : vector<2x128xf32>
    %95 = tpu.matmul %93, %94, %cst_51 {dimension_numbers = #tpu.dot_dimension_numbers<[1], [0], [0], [1], [0, 0, 1, 1], [], []>} : vector<2x128xf32>, vector<128x128xf32>, vector<2x128xf32> -> vector<2x128xf32>
    %c0_52 = arith.constant 0 : index
    %c0_53 = arith.constant 0 : index
    %96 = vector.load %arg7[%c0_52, %c0_53] : memref<1x128xf32, #tpu.memory_space<vmem>>, vector<1x128xf32>
    %97 = vector.broadcast %96 : vector<1x128xf32> to vector<2x128xf32>
    %98 = arith.addf %95, %97 : vector<2x128xf32>
    %cst_54 = arith.constant 0.000000e+00 : f32
    %99 = vector.broadcast %cst_54 : f32 to vector<2x128xf32>
    %100 = arith.maximumf %98, %99 : vector<2x128xf32>
    %c0_55 = arith.constant 0 : index
    %c0_56 = arith.constant 0 : index
    %101 = vector.load %arg8[%c0_55, %c0_56] : memref<128x128xf32, #tpu.memory_space<vmem>>, vector<128x128xf32>
    %cst_57 = arith.constant dense<0.000000e+00> : vector<2x128xf32>
    %102 = tpu.matmul %100, %101, %cst_57 {dimension_numbers = #tpu.dot_dimension_numbers<[1], [0], [0], [1], [0, 0, 1, 1], [], []>} : vector<2x128xf32>, vector<128x128xf32>, vector<2x128xf32> -> vector<2x128xf32>
    %c0_58 = arith.constant 0 : index
    %c0_59 = arith.constant 0 : index
    %103 = vector.load %arg9[%c0_58, %c0_59] : memref<1x128xf32, #tpu.memory_space<vmem>>, vector<1x128xf32>
    %104 = vector.broadcast %103 : vector<1x128xf32> to vector<2x128xf32>
    %105 = arith.addf %102, %104 : vector<2x128xf32>
    %c0_60 = arith.constant 0 : index
    %c0_61 = arith.constant 0 : index
    %106 = vector.load %arg10[%c0_60, %c0_61] : memref<2x128xf32, #tpu.memory_space<vmem>>, vector<2x128xf32>
    tpu.vector_store %arg10[%c0_60, %c0_61], %105 {strides = array<i32>} : memref<2x128xf32, #tpu.memory_space<vmem>>, vector<2x128xf32>,
    return
  }
  func.func @transform_0(%arg0: i32) -> (i32, i32, i32) {
    %c0_i32 = arith.constant 0 : i32
    %c0_i32_0 = arith.constant 0 : i32
    %c0_i32_1 = arith.constant 0 : i32
    return %c0_i32, %arg0, %c0_i32_0 : i32, i32, i32
  }
  func.func @transform_1(%arg0: i32) -> (i32, i32, i32) {
    %c0_i32 = arith.constant 0 : i32
    %c0_i32_0 = arith.constant 0 : i32
    %c0_i32_1 = arith.constant 0 : i32
    %c0_i32_2 = arith.constant 0 : i32
    return %c0_i32, %c0_i32_0, %c0_i32_1 : i32, i32, i32
  }
  func.func @transform_2(%arg0: i32) -> (i32, i32) {
    %c0_i32 = arith.constant 0 : i32
    %c0_i32_0 = arith.constant 0 : i32
    %c0_i32_1 = arith.constant 0 : i32
    return %c0_i32, %c0_i32_0 : i32, i32
  }
  func.func @transform_3(%arg0: i32) -> (i32, i32, i32) {
    %c0_i32 = arith.constant 0 : i32
    %c0_i32_0 = arith.constant 0 : i32
    %c0_i32_1 = arith.constant 0 : i32
    %c0_i32_2 = arith.constant 0 : i32
    return %c0_i32, %c0_i32_0, %c0_i32_1 : i32, i32, i32
  }
  func.func @transform_4(%arg0: i32) -> (i32, i32) {
    %c0_i32 = arith.constant 0 : i32
    %c0_i32_0 = arith.constant 0 : i32
    %c0_i32_1 = arith.constant 0 : i32
    return %c0_i32, %c0_i32_0 : i32, i32
  }
  func.func @transform_5(%arg0: i32) -> (i32, i32) {
    %c0_i32 = arith.constant 0 : i32
    %c0_i32_0 = arith.constant 0 : i32
    %c0_i32_1 = arith.constant 0 : i32
    return %c0_i32, %c0_i32_0 : i32, i32
  }
  func.func @transform_6(%arg0: i32) -> (i32, i32) {
    %c0_i32 = arith.constant 0 : i32
    %c0_i32_0 = arith.constant 0 : i32
    %c0_i32_1 = arith.constant 0 : i32
    return %c0_i32, %c0_i32_0 : i32, i32
  }
  func.func @transform_7(%arg0: i32) -> (i32, i32) {
    %c0_i32 = arith.constant 0 : i32
    %c0_i32_0 = arith.constant 0 : i32
    %c0_i32_1 = arith.constant 0 : i32
    return %c0_i32, %c0_i32_0 : i32, i32
  }
  func.func @transform_8(%arg0: i32) -> (i32, i32) {
    %c0_i32 = arith.constant 0 : i32
    %c0_i32_0 = arith.constant 0 : i32
    %c0_i32_1 = arith.constant 0 : i32
    return %c0_i32, %c0_i32_0 : i32, i32
  }
  func.func @transform_9(%arg0: i32) -> (i32, i32) {
    %c0_i32 = arith.constant 0 : i32
    %c0_i32_0 = arith.constant 0 : i32
    return %arg0, %c0_i32 : i32, i32
  }
}

</mosaic_0001>

<bundles_post_ra>
// kernel: tpu_custom_call.1
= control target key start
LH: loop header
LB: loop body
LE: loop exit
PB: predicated region body
PF: predicated region fallthrough
CT: control target
= control target key end

     0   :  { %14 = vsyncpa [#allocation4], 0  ;;  %s1180_s0 = inlined_call_operand.vmem [shape: f32[4,16,1], index: 0, kind: input, shape index: {}]   ;;  %s1181_s1 = inlined_call_operand.vmem [shape: f32[3,1,16], index: 1, kind: input, shape index: {}]   ;;  %s1182_s2 = inlined_call_operand.vmem [shape: f32[1,16], index: 2, kind: input, shape index: {}]   ;;  %s1183_s3 = inlined_call_operand.vmem [shape: f32[3,16,32], index: 3, kind: input, shape index: {}]   ;;  %s1184_s4 = inlined_call_operand.vmem [shape: f32[1,32], index: 4, kind: input, shape index: {}]   ;;  %s1185_s5 = inlined_call_operand.hbm [shape: f32[128,128], index: 5, kind: input, shape index: {}]   ;;  %s1186_s6 = inlined_call_operand.vmem [shape: f32[1,128], index: 6, kind: input, shape index: {}]   ;;  %s1187_s7 = inlined_call_operand.hbm [shape: f32[128,128], index: 7, kind: input, shape index: {}]   ;;  %s1188_s8 = inlined_call_operand.vmem [shape: f32[1,128], index: 8, kind: input, shape index: {}]   ;;  %s1189_s9 = inlined_call_operand.hbm [shape: f32[2,128], index: 9, kind: output, shape index: {}]  }
   0x1   :  { %15 = vsyncpa [#allocation7], 0 }
   0x2   :  { %16 = vsyncpa [#allocation5], 0  ;;  %s958_s30 = smov [#allocation3]  }
   0x3   :  { %s32_s10 = sshll.u32 %s958_s30, 4  ;;  %s33_s10 = int_to_ptr.vmem [resolvable:$true] %s32_s10 }
   0x4   :  { %s900_s11 = scalar_lea.vmem %s33_s10, 2048  ;;  %p905_p1 = scmp.lt.s32.totalorder %s33_s10, %s33_s10 }
   0x5   :  { %p901_p0 = scmp.ne.s32.totalorder %s33_s10, %s900_s11  ;;  %p906_p2 = scmp.lt.s32.totalorder %s900_s11, %s900_s11 }
   0x7   :  { %p907_p3 = por %p906_p2, %p905_p1 }
   0x9   :  { %p908_p4 = pnand %p907_p3, %p901_p0 }
   0xb   :  { %911 = shalt.err (!%p908_p4)
}
   0xc   :  { %s959_s12 = smov 128   ;;  %s960_s13 = smov 8  }
   0xd   :  { %38 = dma.hbm_to_vmem [thread:$0]  %s1185_s5, 2048, %s33_s10, [#allocation4], %s959_s12, %s959_s12, %s960_s13  }
   0xe   :  { %s961_s16 = smov [#allocation6]  }
   0xf   :  { %s46_s17 = sshll.u32 %s961_s16, 4  ;;  %s47_s17 = int_to_ptr.vmem [resolvable:$true] %s46_s17 }
  0x10   :  { %s920_s18 = scalar_lea.vmem %s47_s17, 2048  ;;  %p925_p6 = scmp.lt.s32.totalorder %s47_s17, %s47_s17 }
  0x11   :  { %p921_p5 = scmp.ne.s32.totalorder %s47_s17, %s920_s18  ;;  %p926_p7 = scmp.lt.s32.totalorder %s920_s18, %s920_s18 }
  0x13   :  { %p927_p8 = por %p926_p7, %p925_p6 }
  0x15   :  { %p928_p9 = pnand %p927_p8, %p921_p5 }
  0x17   :  { %931 = shalt.err (!%p928_p9)
}
  0x18   :  { %52 = dma.hbm_to_vmem [thread:$0]  %s1187_s7, 2048, %s47_s17, [#allocation7], %s959_s12, %s959_s12, %s960_s13  }
  0x19   :  { %952 = dma.done.wait [#allocation4], 2048  }
  0x1a   :  { %953 = vsyncadd [#allocation4], 4294965248 }
  0x1b   :  { %954 = dma.done.wait [#allocation7], 2048  }
  0x1c   :  { %955 = vsyncadd [#allocation7], 4294965248  ;;  %v962_v0 = vmov 0   ;;  %v719_v1 = vld [vmem:[%s1180_s0 + $0x10] sm:$0xff]  ;;  %v67_v2 = vld [vmem:[%s1180_s0] sm:$0xff]  ;;  %v170_v23 = vlaneseq  ;;  %vm220_vm0 = vcmask 130048  }
  0x1d   :  { %891 = vset.pattern.permute.xlu1 %v962_v0  ;;  %890 = vset.pattern.permute.xlu0 %v962_v0  ;;  %v720_v3 = vld [vmem:[%s1180_s0 + $0x18] sm:$0xff]  ;;  %v68_v4 = vld [vmem:[%s1180_s0 + $0x8] sm:$0xff]  ;;  %v721_v6 = vld [vmem:[%s1180_s0 + $0x20] sm:$0xff]  ;;  %vm486_vm7 = vcmask 261120   ;;  %vm964_vm8 = vmmov 0   ;;  %s966_s30 = smov 32  }
  0x1e   :  { %98 = vperm.xlu1 %891, %v719_v1   ;;  %80 = vperm.xlu0 %890, %v67_v2   ;;  %v722_v5 = vld [vmem:[%s1180_s0 + $0x28] sm:$0xff]  ;;  %v724_v7 = vld [vmem:[%s1180_s0 + $0x38] sm:$0xff]  ;;  %v723_v8 = vld [vmem:[%s1180_s0 + $0x30] sm:$0xff]  ;;  %v1076_v34 = vshrl.u32 %v170_v23, 7  ;;  %s967_s10 = smov 96   ;;  %vm509_vm9 = vcmask 523264  }
  0x1f   :  { %v730_v9 = vld [vmem:[%s1183_s3 + $0x18] sm:$0xff]  ;;  %v729_v10 = vld [vmem:[%s1183_s3 + $0x10] sm:$0xff]  ;;  %v216_v11 = vld [vmem:[%s1183_s3 + $0x8] sm:$0xff]  ;;  %vm511_vm10 = vcmask 785408   ;;  %s968_s15 = smov [#allocation8]  }
  0x20   :  { %788 = vmatprep.subr.mxu0 %v730_v9  ;;  %v1061_v12 = vld [vmem:[%s1183_s3 + $0x28] sm:$0xff]  ;;  %795 = vmatprep.subr.mxu1 %v216_v11  ;;  %v215_v13 = vld [vmem:[%s1183_s3] sm:$0xff]  ;;  %v172_v46 = vadd.s32 8, %v1076_v34  ;;  %v177_v53 = vand.u32 7, %v1076_v34  ;;  %vm201_vm1 = vcmp.lt.s32.totalorder %v1076_v34, 1  ;;  %vm210_vm2 = vcmp.lt.s32.totalorder %v1076_v34, 7 }
  0x21   :  { %789 = vmatpush3.msra.mxu0 %v730_v9  ;;  %796 = vmatpush3.msra.mxu1 %v216_v11  ;;  %v725_v16 = vld [vmem:[%s1181_s1] ss:$0 sm:$0xff]  ;;  %v726_v17 = vld [vmem:[%s1181_s1 + $0x1] ss:$0 sm:$0xff]  ;;  %v727_v22 = vld [vmem:[%s1181_s1 + $0x2] ss:$0 sm:$0xff] }
  0x22   :  { %103 = vperm.xlu1 %891, %v720_v3   ;;  %85 = vperm.xlu0 %890, %v68_v4   ;;  %v728_v45 = vld [vmem:[%s1182_s2] ss:$0 sm:$0xff]  ;;  %v184_v54 = vand.u32 7, %v172_v46  ;;  %vm1085_vm3 = vcmp.eq.s32.totalorder %v177_v53, 0  ;;  %vm1089_vm4 = vcmp.eq.s32.totalorder %v177_v53, 7  ;;  %v518_v23 = vld [vmem:[#allocation3 + $0x28] sm:$0xff] }
  0x23   :  { %790 = vmatprep.subr.mxu0 %v729_v10  ;;  %797 = vmatprep.subr.mxu1 %v215_v13  ;;  %v735_v0 = vld [vmem:[%s1183_s3 + $0x20] sm:$0xff]  ;;  %v619_v53 = vld [vmem:[#allocation6 + $0x60] sm:$0xff]  ;;  %v616_v59 = vld [vmem:[#allocation6 + $0x48] sm:$0xff]  ;;  %s707_s16 = sshll.u32 %s968_s15, 4  ;;  %s708_s16 = int_to_ptr.vmem [resolvable:$true] %s707_s16 }
  0x24   :  { %791 = vmatpush3.msra.mxu0 %v729_v10  ;;  %798 = vmatpush3.msra.mxu1 %v215_v13  ;;  %vm1093_vm5 = vcmp.eq.s32.totalorder %v184_v54, 0  ;;  %vm1097_vm6 = vcmp.eq.s32.totalorder %v184_v54, 7  ;;  %v963_v13 = vmov 0.0   ;;  %v621_v34 = vld [vmem:[#allocation6 + $0x70] sm:$0xff]  ;;  %v618_v54 = vld [vmem:[#allocation6 + $0x58] sm:$0xff]  ;;  %v615_v60 = vld [vmem:[#allocation6 + $0x40] sm:$0xff]  ;;  %p937_p11 = scmp.lt.s32.totalorder %s708_s16, %s708_s16 }
  0x25   :  { %802 = vmatprep.subr.mxu0 %v1061_v12  ;;  %809 = vmatprep.subr.mxu1 %v963_v13  ;;  %v614_v61 = vld [vmem:[#allocation6 + $0x38] sm:$0xff]  ;;  %v613_v62 = vld [vmem:[#allocation6 + $0x30] sm:$0xff]  ;;  %s932_s17 = scalar_lea.vmem %s708_s16, 32 }
  0x26   :  { %123 = vperm.xlu1 %891, %v722_v5   ;;  %118 = vperm.xlu0 %890, %v721_v6   ;;  %p933_p10 = scmp.ne.s32.totalorder %s708_s16, %s932_s17  ;;  %p938_p12 = scmp.lt.s32.totalorder %s932_s17, %s932_s17 }
  0x28   :  { %p939_p13 = por %p938_p12, %p937_p11 }
  0x2a   :  { %157 = vperm.xlu1 %891, %v724_v7   ;;  %152 = vperm.xlu0 %890, %v723_v8   ;;  %p940_p0 = pnand %p939_p13, %p933_p10 }
  0x99   :  { %v99_v14 = vpop.permute.xlu1 %98  ;;  %v81_v15 = vpop.permute.xlu0 %80 }
  0x9a   :  { %v112_v24 = vmul.f32 %v726_v17, %v99_v14  ;;  %v94_v25 = vmul.f32 %v725_v16, %v81_v15  ;;  %v144_v35 = vmul.f32 %v725_v16, %v99_v14  ;;  %v527_v14 = vld [vmem:[#allocation3 + $0x70] sm:$0xff]  ;;  %v526_v15 = vld [vmem:[#allocation3 + $0x68] sm:$0xff] }
  0x9c   :  { %v114_v36 = vadd.f32 %v112_v24, %v94_v25  ;;  %v517_v24 = vld [vmem:[#allocation3 + $0x20] sm:$0xff]  ;;  %v516_v25 = vld [vmem:[#allocation3 + $0x18] sm:$0xff] }
  0x9d   :  { %v104_v18 = vpop.permute.xlu1 %103  ;;  %v86_v19 = vpop.permute.xlu0 %85 }
  0x9e   :  { %v113_v20 = vmul.f32 %v726_v17, %v104_v18  ;;  %v95_v21 = vmul.f32 %v725_v16, %v86_v19  ;;  %v145_v32 = vmul.f32 %v725_v16, %v104_v18  ;;  %v525_v16 = vld [vmem:[#allocation3 + $0x60] sm:$0xff]  ;;  %v523_v18 = vld [vmem:[#allocation3 + $0x50] sm:$0xff]  ;;  %v522_v19 = vld [vmem:[#allocation3 + $0x48] sm:$0xff] }
  0xa0   :  { %v115_v33 = vadd.f32 %v113_v20, %v95_v21  ;;  %v521_v20 = vld [vmem:[#allocation3 + $0x40] sm:$0xff]  ;;  %v520_v21 = vld [vmem:[#allocation3 + $0x38] sm:$0xff] }
  0xa1   :  { %v124_v26 = vpop.permute.xlu1 %123  ;;  %v119_v27 = vpop.permute.xlu0 %118 }
  0xa2   :  { %v133_v28 = vmul.f32 %v727_v22, %v124_v26  ;;  %v147_v29 = vmul.f32 %v726_v17, %v124_v26  ;;  %v132_v30 = vmul.f32 %v727_v22, %v119_v27  ;;  %v146_v31 = vmul.f32 %v726_v17, %v119_v27  ;;  %v524_v17 = vld [vmem:[#allocation3 + $0x58] sm:$0xff] }
  0xa4   :  { %v135_v37 = vadd.f32 %v133_v28, %v115_v33  ;;  %v149_v38 = vadd.f32 %v147_v29, %v145_v32  ;;  %v134_v41 = vadd.f32 %v132_v30, %v114_v36  ;;  %v148_v42 = vadd.f32 %v146_v31, %v144_v35  ;;  %v739_v31 = vld [vmem:[%s1184_s4] ss:$0 sm:$0xff]  ;;  %s965_s4 = smov 64  }
  0xa5   :  { %v158_v39 = vpop.permute.xlu1 %157  ;;  %v153_v40 = vpop.permute.xlu0 %152 }
  0xa6   :  { %v161_v43 = vmul.f32 %v727_v22, %v158_v39  ;;  %v160_v44 = vmul.f32 %v727_v22, %v153_v40  ;;  %v143_v49 = vadd.f32 %v728_v45, %v135_v37  ;;  %v142_v50 = vadd.f32 %v728_v45, %v134_v41  ;;  %v519_v22 = vld [vmem:[#allocation3 + $0x30] sm:$0xff] }
  0xa8   :  { %v163_v47 = vadd.f32 %v161_v43, %v149_v38  ;;  %v162_v48 = vadd.f32 %v160_v44, %v148_v42  ;;  %v515_v44 = vld [vmem:[#allocation3 + $0x10] sm:$0xff] }
  0xaa   :  { %v165_v51 = vadd.f32 %v728_v45, %v163_v47  ;;  %v164_v52 = vadd.f32 %v728_v45, %v162_v48  ;;  %v514_v45 = vld [vmem:[#allocation3 + $0x8] sm:$0xff] }
  0xac   :  { %v167_v55 = vmax.f32 %v143_v49, %v165_v51  ;;  %v166_v56 = vmax.f32 %v142_v50, %v164_v52  ;;  %v513_v50 = vld [vmem:[#allocation3] sm:$0xff]  ;;  %v622_v51 = vld [vmem:[#allocation6 + $0x78] sm:$0xff]  ;;  %v620_v52 = vld [vmem:[#allocation6 + $0x68] sm:$0xff] }
  0xae   :  { %v169_v57 = vmax.f32 %v167_v55, 0.0  ;;  %v168_v58 = vmax.f32 %v166_v56, 0.0 }
  0xb0   :  { %v208_v63 = vrot.slane %v168_v58, 1  ;;  %792 = vmatprep.mubr.msk.f32.mxu0 %vm220_vm0, %v168_v58  ;;  %v199_v1 = vrot.slane %v168_v58, 7  ;;  %v200_v2 = vrot.slane %v169_v57, 7  ;;  %v209_v3 = vrot.slane %v169_v57, 1 }
  0xb1   :  { %793 = vmatmul.mubr.msk.f32.vlgmr.msra.gmra.mxu0 %vm220_vm0, %v169_v57  ;;  %v617_v57 = vld [vmem:[#allocation6 + $0x50] sm:$0xff] }
  0xb2   :  { %803 = vmatpush3.msra.mxu0 %v1061_v12  ;;  %v203_v4 = vsel %vm201_vm1, %v200_v2, %v199_v1  ;;  %v211_v5 = vsel %vm210_vm2, %v208_v63, %v209_v3  ;;  %v202_v6 = vsel %vm201_vm1, %v199_v1, %v200_v2  ;;  %v212_v7 = vsel %vm210_vm2, %v209_v3, %v208_v63  ;;  %v528_v12 = vld [vmem:[#allocation3 + $0x78] sm:$0xff]  ;;  %v612_v63 = vld [vmem:[#allocation6 + $0x28] sm:$0xff] }
  0xb3   :  { %804 = vmatprep.subr.mxu0 %v735_v0  ;;  %v204_v8 = vsel %vm1085_vm3, 0.0, %v203_v4  ;;  %v213_v9 = vsel %vm1089_vm4, 0.0, %v211_v5  ;;  %v205_v10 = vsel %vm1093_vm5, 0.0, %v202_v6  ;;  %v214_v11 = vsel %vm1097_vm6, 0.0, %v212_v7  ;;  %v610_v1 = vld [vmem:[#allocation6 + $0x18] sm:$0xff] }
  0xb4   :  { %799 = vmatprep.mubr.msk.f32.mxu1 %vm220_vm0, %v204_v8  ;;  %805 = vmatpush3.msra.mxu0 %v735_v0  ;;  %v611_v0 = vld [vmem:[#allocation6 + $0x20] sm:$0xff] }
  0xb5   :  { %806 = vmatprep.mubr.msk.f32.mxu0 %vm220_vm0, %v213_v9  ;;  %800 = vmatmul.mubr.msk.f32.vlgmr.msra.gmra.mxu1 %vm220_vm0, %v205_v10  ;;  %v609_v9 = vld [vmem:[#allocation6 + $0x10] sm:$0xff]  ;;  %v608_v10 = vld [vmem:[#allocation6 + $0x8] sm:$0xff] }
  0xb6   :  { %807 = vmatmul.mubr.msk.f32.vlgmr.msra.gmra.mxu0 %vm220_vm0, %v214_v11  ;;  %844 = vmatprep.subr.mxu0 %v963_v13  ;;  %v607_v11 = vld [vmem:[#allocation6] sm:$0xff] }
  0xb7   :  { %810 = vmatpush3.msra.mxu1 %v528_v12  ;;  %841 = vmatprep.mubr.msk.f32.mxu1 %vm964_vm8, %v963_v13  ;;  %v740_v12 = vld [vmem:[%s1186_s6] ss:$0 sm:$0xff] }
  0xb8   :  { %811 = vmatprep.subr.mxu1 %v963_v13  ;;  %845 = vmatpush3.msra.mxu0 %v622_v51 }
  0xb9   :  { %812 = vmatpush3.msra.mxu1 %v527_v14  ;;  %876 = vmatprep.mubr.msk.f32.mxu0 %vm964_vm8, %v963_v13 }
  0xba   :  { %813 = vmatprep.subr.mxu1 %v963_v13  ;;  %846 = vmatprep.subr.mxu0 %v963_v13 }
  0xbb   :  { %814 = vmatpush3.msra.mxu1 %v526_v15  ;;  %847 = vmatpush3.msra.mxu0 %v621_v34 }
  0xbc   :  { %815 = vmatprep.subr.mxu1 %v963_v13  ;;  %848 = vmatprep.subr.mxu0 %v963_v13 }
  0xbd   :  { %816 = vmatpush3.msra.mxu1 %v525_v16  ;;  %849 = vmatpush3.msra.mxu0 %v620_v52 }
  0xbe   :  { %817 = vmatprep.subr.mxu1 %v963_v13  ;;  %850 = vmatprep.subr.mxu0 %v963_v13 }
  0xbf   :  { %818 = vmatpush3.msra.mxu1 %v524_v17  ;;  %851 = vmatpush3.msra.mxu0 %v619_v53 }
  0xc0   :  { %819 = vmatprep.subr.mxu1 %v963_v13  ;;  %852 = vmatprep.subr.mxu0 %v963_v13 }
  0xc1   :  { %820 = vmatpush3.msra.mxu1 %v523_v18  ;;  %853 = vmatpush3.msra.mxu0 %v618_v54  ;;  %v741_v18 = vld [vmem:[%s1188_s8] ss:$0 sm:$0xff] }
  0xc2   :  { %821 = vmatprep.subr.mxu1 %v963_v13  ;;  %854 = vmatprep.subr.mxu0 %v963_v13 }
  0xc3   :  { %822 = vmatpush3.msra.mxu1 %v522_v19  ;;  %855 = vmatpush3.msra.mxu0 %v617_v57 }
  0xc4   :  { %823 = vmatprep.subr.mxu1 %v963_v13  ;;  %856 = vmatprep.subr.mxu0 %v963_v13 }
  0xc5   :  { %824 = vmatpush3.msra.mxu1 %v521_v20  ;;  %857 = vmatpush3.msra.mxu0 %v616_v59 }
  0xc6   :  { %825 = vmatprep.subr.mxu1 %v963_v13  ;;  %858 = vmatprep.subr.mxu0 %v963_v13 }
  0xc7   :  { %826 = vmatpush3.msra.mxu1 %v520_v21  ;;  %859 = vmatpush3.msra.mxu0 %v615_v60 }
  0xc8   :  { %827 = vmatprep.subr.mxu1 %v963_v13  ;;  %860 = vmatprep.subr.mxu0 %v963_v13 }
  0xc9   :  { %828 = vmatpush3.msra.mxu1 %v519_v22  ;;  %861 = vmatpush3.msra.mxu0 %v614_v61 }
  0xca   :  { %829 = vmatprep.subr.mxu1 %v963_v13  ;;  %862 = vmatprep.subr.mxu0 %v963_v13 }
  0xcb   :  { %830 = vmatpush3.msra.mxu1 %v518_v23  ;;  %863 = vmatpush3.msra.mxu0 %v613_v62 }
  0xcc   :  { %831 = vmatprep.subr.mxu1 %v963_v13  ;;  %864 = vmatprep.subr.mxu0 %v963_v13 }
  0xcd   :  { %832 = vmatpush3.msra.mxu1 %v517_v24  ;;  %865 = vmatpush3.msra.mxu0 %v612_v63 }
  0xce   :  { %833 = vmatprep.subr.mxu1 %v963_v13  ;;  %866 = vmatprep.subr.mxu0 %v963_v13 }
  0xcf   :  { %834 = vmatpush3.msra.mxu1 %v516_v25  ;;  %867 = vmatpush3.msra.mxu0 %v611_v0 }
  0xd0   :  { %835 = vmatprep.subr.mxu1 %v963_v13  ;;  %868 = vmatprep.subr.mxu0 %v963_v13 }
  0xd1   :  { %836 = vmatpush3.msra.mxu1 %v515_v44  ;;  %869 = vmatpush3.msra.mxu0 %v610_v1 }
  0xd2   :  { %837 = vmatprep.subr.mxu1 %v963_v13  ;;  %870 = vmatprep.subr.mxu0 %v963_v13 }
  0xd3   :  { %838 = vmatpush3.msra.mxu1 %v514_v45  ;;  %871 = vmatpush3.msra.mxu0 %v609_v9 }
  0xd4   :  { %839 = vmatprep.subr.mxu1 %v963_v13  ;;  %872 = vmatprep.subr.mxu0 %v963_v13 }
  0xd5   :  { %840 = vmatpush3.msra.mxu1 %v513_v50  ;;  %873 = vmatpush3.msra.mxu0 %v608_v10 }
  0xd6   :  { %874 = vmatprep.subr.mxu0 %v963_v13 }
  0xd7   :  { %875 = vmatpush3.msra.mxu0 %v607_v11 }
 0x171   :  { %v794_v26 = vpop.f32.mrf.mxu0 }
 0x173   :  { %v293_v27 = vpop.f32.mrf.mxu0 }
 0x175   :  { %v801_v28 = vpop.f32.mrf.mxu1 }
 0x176   :  { %v380_v29 = vadd.f32 %v801_v28, %v794_v26  ;;  %v808_v30 = vpop.f32.mrf.mxu0 }
 0x177   :  { %v374_v32 = vpop.f32.mrf.mxu1 }
 0x178   :  { %v468_v33 = vadd.f32 %v808_v30, %v380_v29  ;;  %v375_v35 = vadd.f32 %v374_v32, %v293_v27  ;;  %v458_v36 = vpop.f32.mrf.mxu0 }
 0x17a   :  { %v477_v37 = vadd.f32 %v739_v31, %v468_v33  ;;  %v467_v38 = vadd.f32 %v458_v36, %v375_v35 }
 0x17c   :  { %v479_v39 = vmax.f32 %v477_v37, 0.0  ;;  %v476_v40 = vadd.f32 %v739_v31, %v467_v38 }
 0x17e   :  { %v478_v41 = vmax.f32 %v476_v40, 0.0  ;;  %v481_v42 = vrot.slane %v479_v39, 1 }
 0x180   :  { %v480_v43 = vrot.slane %v478_v41, 1 }
 0x182   :  { %v482_v46 = vsel %vm210_vm2, %v480_v43, %v481_v42  ;;  %v483_v47 = vsel %vm210_vm2, %v481_v42, %v480_v43 }
 0x183   :  { %v484_v48 = vmax.f32 %v478_v41, %v482_v46  ;;  %v485_v49 = vmax.f32 %v479_v39, %v483_v47 }
 0x185   :  { %487 = vst.msk [vmem:[#allocation2] sm:$0xff] %vm486_vm7, %v484_v48  ;;  %488 = vst.msk [vmem:[#allocation2 + $0x8] sm:$0xff] %vm486_vm7, %v485_v49 }
 0x18c   :  { %v493_v55 = vld [vmem:[#allocation2 + $0x4] ss:$8 sm:$0x3]  ;;  %v491_v56 = vld [vmem:[#allocation2 + $0x2] ss:$8 sm:$0x3] }
 0x18d   :  { %501 = vrot.lane.b32.xlu1 %v493_v55, %s965_s4  ;;  %497 = vrot.lane.b32.xlu0 %v491_v56, %s966_s30  ;;  %v495_v58 = vld [vmem:[#allocation2 + $0x6] ss:$8 sm:$0x3]  ;;  %v489_v3 = vld [vmem:[#allocation2] ss:$8 sm:$0x3] }
 0x191   :  { %505 = vrot.lane.b32.xlu0 %v495_v58, %s967_s10 }
 0x1ff   :  { %v498_v2 = vpop.permute.xlu0 %497  ;;  %v502_v4 = vpop.permute.xlu1 %501 }
 0x200   :  { %v508_v5 = vsel %vm486_vm7, %v489_v3, %v498_v2 }
 0x201   :  { %v510_v7 = vsel %vm509_vm9, %v508_v5, %v502_v4 }
 0x203   :  { %v506_v6 = vpop.permute.xlu0 %505 }
 0x204   :  { %v512_v8 = vsel %vm511_vm10, %v510_v7, %v506_v6 }
 0x205   :  { %842 = vmatmul.mubr.f32.vlgmr.msra.gmra.mxu1 %v512_v8 }
 0x2c5   :  { %v602_v14 = vpop.f32.mrf.mxu1 }
 0x2c6   :  { %v603_v15 = vadd.f32 %v740_v12, %v602_v14 }
 0x2c7   :  { %v843_v16 = vpop.f32.mrf.mxu1 }
 0x2c8   :  { %v606_v17 = vmax.f32 %v603_v15, 0.0 }
 0x2ca   :  { %877 = vmatmul.mubr.f32.vlgmr.msra.gmra.mxu0 %v606_v17 }
 0x38a   :  { %v696_v19 = vpop.f32.mrf.mxu0 }
 0x38b   :  { %v697_v20 = vadd.f32 %v741_v18, %v696_v19 }
 0x38c   :  { %v878_v13 = vpop.f32.mrf.mxu0 }
 0x38d   :  { %700 = vst [vmem:[#allocation8] sm:$0x3] %v697_v20 }
 0x38e   :  { %943 = shalt.err (!%p940_p0)
}
 0x38f   :  { %710 = dma.vmem_to_hbm [thread:$0]  %s708_s16, 32, %s1189_s9, [#allocation5]  }
 0x390   :  { %956 = dma.done.wait [#allocation5], 32  }
 0x391   :  { %957 = vsyncadd [#allocation5], 4294967264 }
 0x392   :  { %714 = vsyncpa [#allocation4], 1 }
 0x393   :  { %715 = vsyncpa [#allocation7], 1 }
 0x394   :  { %716 = vsyncpa [#allocation5], 1 }

</bundles_post_ra>
